<compile_context>
chip_gen: v5e
topology: v5e:2x2
jax: 0.10.0
libtpu: 0.0.40
codegen_flags: <defaults>
</compile_context>

<pallas_src>
import functools
import math

import jax
import jax.numpy as jnp
from jax.experimental import pallas as pl
from jax.experimental.pallas import tpu as pltpu

# Keep the pure-JAX reference at full f32 matmul precision so it matches the
# kernel (which also requests HIGHEST precision explicitly).
jax.config.update("jax_default_matmul_precision", "highest")

F_PAD = 128  # lane-dense padded feature width (covers input=8, hidden=32, out=2)


def _mlp_kernel(x_ref, w_ref, p_ref, o_ref, *, num_layers, do_norm):
    # x_ref: (B, F)   w_ref: (L, F, F)   p_ref: (L, 8, F) rows = [bias, gamma, beta]
    # o_ref: (B, F)   All feature dims padded to F = 128 lanes.
    y = x_ref[...]
    for i in range(num_layers):
        y = jnp.dot(y, w_ref[i], preferred_element_type=jnp.float32,
                    precision=jax.lax.Precision.HIGHEST)  # MXU, full f32
        pvec = p_ref[i]  # (8, F); row 0 = bias, row 1 = gamma, row 2 = beta
        y = y + pvec[0:1, :]  # nn.Linear bias
        if do_norm:
            # BatchNorm1d(track_running_stats=False): batch statistics, biased
            # variance, eps = 1e-5, affine.  Padded lanes have gamma=beta=0 so
            # they stay exactly zero.
            mean = jnp.mean(y, axis=0, keepdims=True)
            centered = y - mean
            var = jnp.mean(centered * centered, axis=0, keepdims=True)
            y = centered * (pvec[1:2, :] * jax.lax.rsqrt(var + 1e-5)) + pvec[2:3, :]
        if i == num_layers - 1:
            y = 1.0 / (1.0 + jnp.exp(-y))  # sigmoid (exp + divide)
        else:
            y = jnp.maximum(y, 0.0)  # MyActivation.forward == clamp(min=0) (ReLU)
    o_ref[...] = y.astype(o_ref.dtype)


@functools.partial(jax.jit, static_argnames=("do_norm", "output_size"))
def solution_model_forward(x, w_stack, p_stack, *, do_norm, output_size):
    """Runs the whole MLP in a single fused Pallas kernel."""
    B, in_features = x.shape
    L, _, F = w_stack.shape
    x_pad = jnp.zeros((B, F), jnp.float32).at[:, :in_features].set(x)
    kernel = functools.partial(_mlp_kernel, num_layers=L, do_norm=do_norm)
    out = pl.pallas_call(
        kernel,
        out_shape=jax.ShapeDtypeStruct((B, F), jnp.float32),
        in_specs=[pl.BlockSpec(memory_space=pltpu.MemorySpace.VMEM)] * 3,
        out_specs=pl.BlockSpec(memory_space=pltpu.MemorySpace.VMEM),
    )(x_pad, w_stack, p_stack)
    return out[:, :output_size]


def init_params(key, layer_sizes, f_pad=F_PAD):
    """Deterministic init mimicking nn.Linear defaults (uniform +-1/sqrt(fan_in)).

    Returns:
      (w_stack, p_stack): padded, stacked kernel inputs.
        w_stack: (L, f_pad, f_pad)  weight (in, out) at [:in, :out], zeros elsewhere
        p_stack: (L, 8, f_pad)      row 0 = bias, row 1 = gamma, row 2 = beta
      raw: list of (W, bias, gamma, beta) unpadded arrays for the JAX reference.
    """
    num_layers = len(layer_sizes) - 1
    w_stack = jnp.zeros((num_layers, f_pad, f_pad), jnp.float32)
    p_stack = jnp.zeros((num_layers, 8, f_pad), jnp.float32)
    raw = []
    for li, (a, b) in enumerate(zip(layer_sizes, layer_sizes[1:])):
        key, kw, kb = jax.random.split(key, 3)
        bound = 1.0 / math.sqrt(a)
        W = jax.random.uniform(kw, (a, b), jnp.float32, -bound, bound)
        bias = jax.random.uniform(kb, (b,), jnp.float32, -bound, bound)
        gamma = jnp.ones((b,), jnp.float32)   # BatchNorm1d weight
        beta = jnp.zeros((b,), jnp.float32)   # BatchNorm1d bias
        raw.append((W, bias, gamma, beta))
        w_stack = w_stack.at[li, :a, :b].set(W)
        p_stack = p_stack.at[li, 0, :b].set(bias)
        p_stack = p_stack.at[li, 1, :b].set(gamma)
        p_stack = p_stack.at[li, 2, :b].set(beta)
    return (w_stack, p_stack), raw


def reference_forward(x, raw_params, *, do_norm):
    """Pure-JAX reference matching the PyTorch module semantics."""
    n = len(raw_params)
    for i, (W, bias, gamma, beta) in enumerate(raw_params):
        y = jnp.dot(x, W, precision=jax.lax.Precision.HIGHEST) + bias
        if do_norm:
            mean = jnp.mean(y, axis=0, keepdims=True)
            var = jnp.mean((y - mean) ** 2, axis=0, keepdims=True)
            y = (y - mean) * jax.lax.rsqrt(var + 1e-5) * gamma + beta
        if i == n - 1:
            y = 1.0 / (1.0 + jnp.exp(-y))
        else:
            y = jnp.maximum(y, 0.0)
        x = y
    return x


if __name__ == "__main__":
    # Small config consistent with the module: input_size=8, hidden_size=32,
    # layers_number=2, output_size=2; batch=8.
    input_size, hidden_size, layers_number, output_size = 8, 32, 2, 2
    batch = 8
    layer_sizes = [input_size] + [hidden_size] * layers_number + [output_size]

    key = jax.random.PRNGKey(0)
    key, kx = jax.random.split(key)
    x = jax.random.normal(kx, (batch, input_size), jnp.float32)
    (w_stack, p_stack), raw = init_params(key, layer_sizes)

    # TODO(synk): only the forward pass is implemented; MyActivation.backward,
    # calc_error (BCELoss) and calc_predict are training/eval helpers outside
    # the forward graph.

    # Exercise both the BatchNorm path (do_norm=True, the default config) and
    # the bias-only path (do_norm=False).
    for do_norm in (True, False):
        out = solution_model_forward(
            x, w_stack, p_stack, do_norm=do_norm, output_size=output_size)
        out = jax.block_until_ready(out)
        ref = reference_forward(x, raw, do_norm=do_norm)
        assert out.shape == (batch, output_size)
        diff = float(jnp.max(jnp.abs(out - ref)))
        assert diff < 2e-3, (
            f"mismatch vs reference (do_norm={do_norm}), max|diff|={diff:.3e}")

    print("KERNEL_OK")
</pallas_src>

<mosaic_0001>
module attributes {stable_mosaic.version = 11 : i64} {
  func.func @_mlp_kernel(%arg0: memref<8x128xf32, #tpu.memory_space<vmem>>, %arg1: memref<3x128x128xf32, #tpu.memory_space<vmem>>, %arg2: memref<3x8x128xf32, #tpu.memory_space<vmem>>, %arg3: memref<8x128xf32, #tpu.memory_space<vmem>>) attributes {dimension_semantics = [], scalar_prefetch = 0 : i64, scratch_operands = 0 : i64, tpu.core_type = #tpu.core_type<tc>} {
    %c0 = arith.constant 0 : index
    %c0_0 = arith.constant 0 : index
    %0 = vector.load %arg0[%c0, %c0_0] : memref<8x128xf32, #tpu.memory_space<vmem>>, vector<8x128xf32>
    %c0_1 = arith.constant 0 : index
    %c0_2 = arith.constant 0 : index
    %c0_3 = arith.constant 0 : index
    %1 = vector.load %arg1[%c0_1, %c0_2, %c0_3] : memref<3x128x128xf32, #tpu.memory_space<vmem>>, vector<1x128x128xf32>
    %2 = vector.shape_cast %1 : vector<1x128x128xf32> to vector<128x128xf32>
    %cst = arith.constant dense<0.000000e+00> : vector<8x128xf32>
    %3 = tpu.matmul %0, %2, %cst {dimension_numbers = #tpu.dot_dimension_numbers<[1], [0], [0], [1], [0, 0, 1, 1], [], []>, precision = #tpu.contract_precision<fp32>} : vector<8x128xf32>, vector<128x128xf32>, vector<8x128xf32> -> vector<8x128xf32>
    %c0_4 = arith.constant 0 : index
    %c0_5 = arith.constant 0 : index
    %c0_6 = arith.constant 0 : index
    %4 = vector.load %arg2[%c0_4, %c0_5, %c0_6] : memref<3x8x128xf32, #tpu.memory_space<vmem>>, vector<1x8x128xf32>
    %5 = vector.shape_cast %4 : vector<1x8x128xf32> to vector<8x128xf32>
    %6 = vector.extract_strided_slice %5 {offsets = [0, 0], sizes = [1, 128], strides = [1, 1]} : vector<8x128xf32> to vector<1x128xf32>
    %7 = vector.broadcast %6 : vector<1x128xf32> to vector<8x128xf32>
    %8 = arith.addf %3, %7 : vector<8x128xf32>
    %cst_7 = arith.constant dense<0.000000e+00> : vector<128xf32>
    %9 = vector.multi_reduction <add>, %8, %cst_7 [0] : vector<8x128xf32> to vector<128xf32>
    %10 = vector.shape_cast %9 : vector<128xf32> to vector<1x128xf32>
    %cst_8 = arith.constant 8.000000e+00 : f32
    %11 = vector.broadcast %cst_8 : f32 to vector<1x128xf32>
    %12 = arith.divf %10, %11 : vector<1x128xf32>
    %13 = vector.broadcast %12 : vector<1x128xf32> to vector<8x128xf32>
    %14 = arith.subf %8, %13 : vector<8x128xf32>
    %15 = arith.mulf %14, %14 : vector<8x128xf32>
    %cst_9 = arith.constant dense<0.000000e+00> : vector<128xf32>
    %16 = vector.multi_reduction <add>, %15, %cst_9 [0] : vector<8x128xf32> to vector<128xf32>
    %17 = vector.shape_cast %16 : vector<128xf32> to vector<1x128xf32>
    %cst_10 = arith.constant 8.000000e+00 : f32
    %18 = vector.broadcast %cst_10 : f32 to vector<1x128xf32>
    %19 = arith.divf %17, %18 : vector<1x128xf32>
    %20 = vector.extract_strided_slice %5 {offsets = [1, 0], sizes = [1, 128], strides = [1, 1]} : vector<8x128xf32> to vector<1x128xf32>
    %cst_11 = arith.constant 9.99999974E-6 : f32
    %21 = vector.broadcast %cst_11 : f32 to vector<1x128xf32>
    %22 = arith.addf %19, %21 : vector<1x128xf32>
    %23 = math.rsqrt %22 : vector<1x128xf32>
    %24 = arith.mulf %20, %23 : vector<1x128xf32>
    %25 = vector.broadcast %24 : vector<1x128xf32> to vector<8x128xf32>
    %26 = arith.mulf %14, %25 : vector<8x128xf32>
    %27 = vector.extract_strided_slice %5 {offsets = [2, 0], sizes = [1, 128], strides = [1, 1]} : vector<8x128xf32> to vector<1x128xf32>
    %28 = vector.broadcast %27 : vector<1x128xf32> to vector<8x128xf32>
    %29 = arith.addf %26, %28 : vector<8x128xf32>
    %cst_12 = arith.constant 0.000000e+00 : f32
    %30 = vector.broadcast %cst_12 : f32 to vector<8x128xf32>
    %31 = arith.maximumf %29, %30 : vector<8x128xf32>
    %c1 = arith.constant 1 : index
    %c0_13 = arith.constant 0 : index
    %c0_14 = arith.constant 0 : index
    %32 = vector.load %arg1[%c1, %c0_13, %c0_14] : memref<3x128x128xf32, #tpu.memory_space<vmem>>, vector<1x128x128xf32>
    %33 = vector.shape_cast %32 : vector<1x128x128xf32> to vector<128x128xf32>
    %cst_15 = arith.constant dense<0.000000e+00> : vector<8x128xf32>
    %34 = tpu.matmul %31, %33, %cst_15 {dimension_numbers = #tpu.dot_dimension_numbers<[1], [0], [0], [1], [0, 0, 1, 1], [], []>, precision = #tpu.contract_precision<fp32>} : vector<8x128xf32>, vector<128x128xf32>, vector<8x128xf32> -> vector<8x128xf32>
    %c1_16 = arith.constant 1 : index
    %c0_17 = arith.constant 0 : index
    %c0_18 = arith.constant 0 : index
    %35 = vector.load %arg2[%c1_16, %c0_17, %c0_18] : memref<3x8x128xf32, #tpu.memory_space<vmem>>, vector<1x8x128xf32>
    %36 = vector.shape_cast %35 : vector<1x8x128xf32> to vector<8x128xf32>
    %37 = vector.extract_strided_slice %36 {offsets = [0, 0], sizes = [1, 128], strides = [1, 1]} : vector<8x128xf32> to vector<1x128xf32>
    %38 = vector.broadcast %37 : vector<1x128xf32> to vector<8x128xf32>
    %39 = arith.addf %34, %38 : vector<8x128xf32>
    %cst_19 = arith.constant dense<0.000000e+00> : vector<128xf32>
    %40 = vector.multi_reduction <add>, %39, %cst_19 [0] : vector<8x128xf32> to vector<128xf32>
    %41 = vector.shape_cast %40 : vector<128xf32> to vector<1x128xf32>
    %cst_20 = arith.constant 8.000000e+00 : f32
    %42 = vector.broadcast %cst_20 : f32 to vector<1x128xf32>
    %43 = arith.divf %41, %42 : vector<1x128xf32>
    %44 = vector.broadcast %43 : vector<1x128xf32> to vector<8x128xf32>
    %45 = arith.subf %39, %44 : vector<8x128xf32>
    %46 = arith.mulf %45, %45 : vector<8x128xf32>
    %cst_21 = arith.constant dense<0.000000e+00> : vector<128xf32>
    %47 = vector.multi_reduction <add>, %46, %cst_21 [0] : vector<8x128xf32> to vector<128xf32>
    %48 = vector.shape_cast %47 : vector<128xf32> to vector<1x128xf32>
    %cst_22 = arith.constant 8.000000e+00 : f32
    %49 = vector.broadcast %cst_22 : f32 to vector<1x128xf32>
    %50 = arith.divf %48, %49 : vector<1x128xf32>
    %51 = vector.extract_strided_slice %36 {offsets = [1, 0], sizes = [1, 128], strides = [1, 1]} : vector<8x128xf32> to vector<1x128xf32>
    %cst_23 = arith.constant 9.99999974E-6 : f32
    %52 = vector.broadcast %cst_23 : f32 to vector<1x128xf32>
    %53 = arith.addf %50, %52 : vector<1x128xf32>
    %54 = math.rsqrt %53 : vector<1x128xf32>
    %55 = arith.mulf %51, %54 : vector<1x128xf32>
    %56 = vector.broadcast %55 : vector<1x128xf32> to vector<8x128xf32>
    %57 = arith.mulf %45, %56 : vector<8x128xf32>
    %58 = vector.extract_strided_slice %36 {offsets = [2, 0], sizes = [1, 128], strides = [1, 1]} : vector<8x128xf32> to vector<1x128xf32>
    %59 = vector.broadcast %58 : vector<1x128xf32> to vector<8x128xf32>
    %60 = arith.addf %57, %59 : vector<8x128xf32>
    %cst_24 = arith.constant 0.000000e+00 : f32
    %61 = vector.broadcast %cst_24 : f32 to vector<8x128xf32>
    %62 = arith.maximumf %60, %61 : vector<8x128xf32>
    %c2 = arith.constant 2 : index
    %c0_25 = arith.constant 0 : index
    %c0_26 = arith.constant 0 : index
    %63 = vector.load %arg1[%c2, %c0_25, %c0_26] : memref<3x128x128xf32, #tpu.memory_space<vmem>>, vector<1x128x128xf32>
    %64 = vector.shape_cast %63 : vector<1x128x128xf32> to vector<128x128xf32>
    %cst_27 = arith.constant dense<0.000000e+00> : vector<8x128xf32>
    %65 = tpu.matmul %62, %64, %cst_27 {dimension_numbers = #tpu.dot_dimension_numbers<[1], [0], [0], [1], [0, 0, 1, 1], [], []>, precision = #tpu.contract_precision<fp32>} : vector<8x128xf32>, vector<128x128xf32>, vector<8x128xf32> -> vector<8x128xf32>
    %c2_28 = arith.constant 2 : index
    %c0_29 = arith.constant 0 : index
    %c0_30 = arith.constant 0 : index
    %66 = vector.load %arg2[%c2_28, %c0_29, %c0_30] : memref<3x8x128xf32, #tpu.memory_space<vmem>>, vector<1x8x128xf32>
    %67 = vector.shape_cast %66 : vector<1x8x128xf32> to vector<8x128xf32>
    %68 = vector.extract_strided_slice %67 {offsets = [0, 0], sizes = [1, 128], strides = [1, 1]} : vector<8x128xf32> to vector<1x128xf32>
    %69 = vector.broadcast %68 : vector<1x128xf32> to vector<8x128xf32>
    %70 = arith.addf %65, %69 : vector<8x128xf32>
    %cst_31 = arith.constant dense<0.000000e+00> : vector<128xf32>
    %71 = vector.multi_reduction <add>, %70, %cst_31 [0] : vector<8x128xf32> to vector<128xf32>
    %72 = vector.shape_cast %71 : vector<128xf32> to vector<1x128xf32>
    %cst_32 = arith.constant 8.000000e+00 : f32
    %73 = vector.broadcast %cst_32 : f32 to vector<1x128xf32>
    %74 = arith.divf %72, %73 : vector<1x128xf32>
    %75 = vector.broadcast %74 : vector<1x128xf32> to vector<8x128xf32>
    %76 = arith.subf %70, %75 : vector<8x128xf32>
    %77 = arith.mulf %76, %76 : vector<8x128xf32>
    %cst_33 = arith.constant dense<0.000000e+00> : vector<128xf32>
    %78 = vector.multi_reduction <add>, %77, %cst_33 [0] : vector<8x128xf32> to vector<128xf32>
    %79 = vector.shape_cast %78 : vector<128xf32> to vector<1x128xf32>
    %cst_34 = arith.constant 8.000000e+00 : f32
    %80 = vector.broadcast %cst_34 : f32 to vector<1x128xf32>
    %81 = arith.divf %79, %80 : vector<1x128xf32>
    %82 = vector.extract_strided_slice %67 {offsets = [1, 0], sizes = [1, 128], strides = [1, 1]} : vector<8x128xf32> to vector<1x128xf32>
    %cst_35 = arith.constant 9.99999974E-6 : f32
    %83 = vector.broadcast %cst_35 : f32 to vector<1x128xf32>
    %84 = arith.addf %81, %83 : vector<1x128xf32>
    %85 = math.rsqrt %84 : vector<1x128xf32>
    %86 = arith.mulf %82, %85 : vector<1x128xf32>
    %87 = vector.broadcast %86 : vector<1x128xf32> to vector<8x128xf32>
    %88 = arith.mulf %76, %87 : vector<8x128xf32>
    %89 = vector.extract_strided_slice %67 {offsets = [2, 0], sizes = [1, 128], strides = [1, 1]} : vector<8x128xf32> to vector<1x128xf32>
    %90 = vector.broadcast %89 : vector<1x128xf32> to vector<8x128xf32>
    %91 = arith.addf %88, %90 : vector<8x128xf32>
    %cst_36 = arith.constant 0.000000e+00 : f32
    %92 = vector.broadcast %cst_36 : f32 to vector<8x128xf32>
    %93 = arith.subf %92, %91 : vector<8x128xf32>
    %94 = math.exp %93 : vector<8x128xf32>
    %cst_37 = arith.constant 1.000000e+00 : f32
    %95 = vector.broadcast %cst_37 : f32 to vector<8x128xf32>
    %96 = arith.addf %95, %94 : vector<8x128xf32>
    %cst_38 = arith.constant 1.000000e+00 : f32
    %97 = vector.broadcast %cst_38 : f32 to vector<8x128xf32>
    %98 = arith.divf %97, %96 : vector<8x128xf32>
    %c0_39 = arith.constant 0 : index
    %c0_40 = arith.constant 0 : index
    %99 = vector.load %arg3[%c0_39, %c0_40] : memref<8x128xf32, #tpu.memory_space<vmem>>, vector<8x128xf32>
    tpu.vector_store %arg3[%c0_39, %c0_40], %98 {strides = array<i32>} : memref<8x128xf32, #tpu.memory_space<vmem>>, vector<8x128xf32>,
    return
  }
}

</mosaic_0001>

<bundles_post_ra>
// kernel: solution_model_forward.1
= control target key start
LH: loop header
LB: loop body
LE: loop exit
PB: predicated region body
PF: predicated region fallthrough
CT: control target
= control target key end

     0   :  { %8 = vsyncpa [#allocation3], 0  ;;  %s1286_s15 = smov [#allocation2]   ;;  %s1287_s17 = smov 128   ;;  %s2045_s0 = inlined_call_operand.vmem [shape: f32[8,128], index: 0, kind: input, shape index: {}]   ;;  %s2046_s1 = inlined_call_operand.hbm [shape: f32[3,128,128], index: 1, kind: input, shape index: {}]   ;;  %s2047_s2 = inlined_call_operand.vmem [shape: f32[3,8,128], index: 2, kind: input, shape index: {}]   ;;  %s2048_s3 = inlined_call_operand.vmem [shape: f32[8,128], index: 3, kind: output, shape index: {}]  }
   0x1   :  { %s15_s14 = sshll.u32 %s2046_s1, 4  ;;  %s17_s16 = sshll.u32 %s1286_s15, 4  ;;  %s16_s14 = int_to_ptr.hbm [resolvable:$true] %s15_s14  ;;  %s18_s16 = int_to_ptr.vmem [resolvable:$true] %s17_s16 }
   0x2   :  { %s1288_s18 = smov 8  }
   0x3   :  { %23 = dma.hbm_to_vmem [thread:$0]  %s16_s14, 6144, %s18_s16, [#allocation3], %s1287_s17, %s1287_s17, %s1288_s18  }
   0x4   :  { %1284 = dma.done.wait [#allocation3], 6144  }
   0x5   :  { %1285 = vsyncadd [#allocation3], 4294961152  ;;  %v46_v0 = vld [vmem:[#allocation2 + $0x78] sm:$0xff]  ;;  %v45_v1 = vld [vmem:[#allocation2 + $0x70] sm:$0xff] }
   0x6   :  { %v44_v2 = vld [vmem:[#allocation2 + $0x68] sm:$0xff]  ;;  %v1313_v3 = vand.u32 4294901760, %v46_v0  ;;  %v1315_v4 = vand.u32 4294901760, %v45_v1  ;;  %v43_v6 = vld [vmem:[#allocation2 + $0x60] sm:$0xff]  ;;  %v42_v7 = vld [vmem:[#allocation2 + $0x58] sm:$0xff] }
   0x7   :  { %v1317_v5 = vand.u32 4294901760, %v44_v2  ;;  %v41_v8 = vld [vmem:[#allocation2 + $0x50] sm:$0xff]  ;;  %v1319_v9 = vand.u32 4294901760, %v43_v6  ;;  %v1321_v10 = vand.u32 4294901760, %v42_v7  ;;  %v40_v12 = vld [vmem:[#allocation2 + $0x48] sm:$0xff]  ;;  %v39_v13 = vld [vmem:[#allocation2 + $0x40] sm:$0xff] }
   0x8   :  { %v1323_v11 = vand.u32 4294901760, %v41_v8  ;;  %50 = vmatpush.msra.mxu0 %v1313_v3  ;;  %v1327_v14 = vsub.f32 %v46_v0, %v1313_v3  ;;  %v1330_v15 = vsub.f32 %v45_v1, %v1315_v4  ;;  %v1335_v17 = vand.u32 4294901760, %v40_v12  ;;  %246 = vmatpush.msra.mxu3 %v1313_v3  ;;  %v38_v21 = vld [vmem:[#allocation2 + $0x38] sm:$0xff]  ;;  %v37_v34 = vld [vmem:[#allocation2 + $0x30] sm:$0xff]  ;;  %v36_v35 = vld [vmem:[#allocation2 + $0x28] sm:$0xff] }
   0x9   :  { %v1333_v16 = vsub.f32 %v44_v2, %v1317_v5  ;;  %v1339_v18 = vsub.f32 %v43_v6, %v1319_v9  ;;  %v1342_v19 = vsub.f32 %v42_v7, %v1321_v10  ;;  %v1344_v20 = vand.u32 4294901760, %v39_v13  ;;  %v35_v42 = vld [vmem:[#allocation2 + $0x20] sm:$0xff]  ;;  %v34_v47 = vld [vmem:[#allocation2 + $0x18] sm:$0xff]  ;;  %v33_v53 = vld [vmem:[#allocation2 + $0x10] sm:$0xff] }
   0xa   :  { %52 = vmatpush.msra.mxu0 %v1315_v4  ;;  %v92_v22 = vand.u32 4294901760, %v1327_v14  ;;  %v98_v23 = vand.u32 4294901760, %v1330_v15  ;;  %v1351_v25 = vsub.f32 %v41_v8, %v1323_v11  ;;  %193 = vmatpush.msra.mxu2 %v1327_v14  ;;  %v1357_v28 = vsub.f32 %v40_v12, %v1335_v17  ;;  %v32_v61 = vld [vmem:[#allocation2 + $0x8] sm:$0xff]  ;;  %v31_v2 = vld [vmem:[#allocation2] sm:$0xff] }
   0xb   :  { %v104_v24 = vand.u32 4294901760, %v1333_v16  ;;  %v110_v26 = vand.u32 4294901760, %v1339_v18  ;;  %v116_v27 = vand.u32 4294901760, %v1342_v19  ;;  %248 = vmatpush.msra.mxu3 %v1315_v4  ;;  %v1370_v32 = vand.u32 4294901760, %v38_v21 }
   0xc   :  { %v93_v29 = vsub.f32 %v1327_v14, %v92_v22  ;;  %54 = vmatpush.msra.mxu0 %v1317_v5  ;;  %v99_v30 = vsub.f32 %v1330_v15, %v98_v23  ;;  %196 = vmatpush.msra.mxu2 %v1330_v15  ;;  %v1374_v33 = vsub.f32 %v39_v13, %v1344_v20  ;;  %v122_v39 = vand.u32 4294901760, %v1351_v25  ;;  %v444_v14 = vld [vmem:[#allocation2 + $0xe8] sm:$0xff] }
   0xd   :  { %v105_v31 = vsub.f32 %v1333_v16, %v104_v24  ;;  %250 = vmatpush.msra.mxu3 %v1317_v5  ;;  %v111_v38 = vsub.f32 %v1339_v18, %v110_v26  ;;  %v117_v40 = vsub.f32 %v1342_v19, %v116_v27  ;;  %v128_v41 = vand.u32 4294901760, %v1357_v28 }
   0xe   :  { %v94_v36 = vand.u32 4294901760, %v93_v29  ;;  %v100_v37 = vand.u32 4294901760, %v99_v30  ;;  %56 = vmatpush.msra.mxu0 %v1319_v9  ;;  %199 = vmatpush.msra.mxu2 %v1333_v16  ;;  %v1389_v44 = vand.u32 4294901760, %v37_v34  ;;  %v1392_v45 = vsub.f32 %v38_v21, %v1370_v32  ;;  %v30_v29 = vld [vmem:[%s2045_s0] sm:$0xff] }
   0xf   :  { %252 = vmatpush.msra.mxu3 %v1319_v9  ;;  %v106_v43 = vand.u32 4294901760, %v105_v31  ;;  %v1394_v46 = vand.u32 4294901760, %v36_v35  ;;  %v134_v48 = vand.u32 4294901760, %v1374_v33  ;;  %v112_v49 = vand.u32 4294901760, %v111_v38 }
  0x10   :  { %95 = vmatpush.msra.mxu1 %v94_v36  ;;  %58 = vmatpush.msra.mxu0 %v1321_v10  ;;  %v123_v50 = vsub.f32 %v1351_v25, %v122_v39  ;;  %v1404_v51 = vsub.f32 %v37_v34, %v1389_v44  ;;  %v1406_v52 = vand.u32 4294901760, %v35_v42  ;;  %v1408_v54 = vand.u32 4294901760, %v34_v47 }
  0x11   :  { %202 = vmatpush.msra.mxu2 %v1339_v18  ;;  %254 = vmatpush.msra.mxu3 %v1321_v10  ;;  %v118_v55 = vand.u32 4294901760, %v117_v40  ;;  %v129_v56 = vsub.f32 %v1357_v28, %v128_v41  ;;  %v140_v57 = vand.u32 4294901760, %v1392_v45  ;;  %v1418_v58 = vsub.f32 %v36_v35, %v1394_v46 }
  0x12   :  { %101 = vmatpush.msra.mxu1 %v100_v37  ;;  %60 = vmatpush.msra.mxu0 %v1323_v11  ;;  %v135_v59 = vsub.f32 %v1374_v33, %v134_v48  ;;  %v1423_v60 = vand.u32 4294901760, %v33_v53  ;;  %v124_v62 = vand.u32 4294901760, %v123_v50  ;;  %v146_v63 = vand.u32 4294901760, %v1404_v51 }
  0x13   :  { %205 = vmatpush.msra.mxu2 %v1342_v19  ;;  %256 = vmatpush.msra.mxu3 %v1323_v11  ;;  %v1430_v0 = vsub.f32 %v35_v42, %v1406_v52  ;;  %v1433_v1 = vsub.f32 %v34_v47, %v1408_v54  ;;  %v130_v6 = vand.u32 4294901760, %v129_v56  ;;  %v141_v7 = vsub.f32 %v1392_v45, %v140_v57  ;;  %v443_v19 = vld [vmem:[#allocation2 + $0xe0] sm:$0xff] }
  0x14   :  { %107 = vmatpush.msra.mxu1 %v106_v43  ;;  %62 = vmatpush.msra.mxu0 %v1335_v17  ;;  %v152_v8 = vand.u32 4294901760, %v1418_v58  ;;  %v1442_v12 = vand.u32 4294901760, %v32_v61  ;;  %v136_v13 = vand.u32 4294901760, %v135_v59  ;;  %v1445_v21 = vsub.f32 %v33_v53, %v1423_v60 }
  0x15   :  { %208 = vmatpush.msra.mxu2 %v1351_v25  ;;  %258 = vmatpush.msra.mxu3 %v1335_v17  ;;  %v147_v30 = vsub.f32 %v1404_v51, %v146_v63  ;;  %v158_v31 = vand.u32 4294901760, %v1430_v0  ;;  %v1457_v34 = vand.u32 4294901760, %v31_v2  ;;  %v1459_v35 = vand.u32 4294901760, %v30_v29 }
  0x16   :  { %113 = vmatpush.msra.mxu1 %v112_v49  ;;  %64 = vmatpush.msra.mxu0 %v1344_v20  ;;  %v164_v36 = vand.u32 4294901760, %v1433_v1  ;;  %v142_v37 = vand.u32 4294901760, %v141_v7  ;;  %v153_v38 = vsub.f32 %v1418_v58, %v152_v8  ;;  %v1469_v40 = vsub.f32 %v32_v61, %v1442_v12 }
  0x17   :  { %211 = vmatpush.msra.mxu2 %v1357_v28  ;;  %260 = vmatpush.msra.mxu3 %v1344_v20  ;;  %v82_v42 = vsub.f32 %v30_v29, %v1459_v35  ;;  %v148_v43 = vand.u32 4294901760, %v147_v30  ;;  %v159_v47 = vsub.f32 %v1430_v0, %v158_v31  ;;  %v170_v49 = vand.u32 4294901760, %v1445_v21 }
  0x18   :  { %119 = vmatpush.msra.mxu1 %v118_v55  ;;  %66 = vmatpush.msra.mxu0 %v1370_v32  ;;  %v1480_v50 = vsub.f32 %v31_v2, %v1457_v34  ;;  %v154_v53 = vand.u32 4294901760, %v153_v38  ;;  %v165_v55 = vsub.f32 %v1433_v1, %v164_v36  ;;  %v176_v56 = vand.u32 4294901760, %v1469_v40 }
  0x19   :  { %214 = vmatpush.msra.mxu2 %v1374_v33  ;;  %262 = vmatpush.msra.mxu3 %v1370_v32  ;;  %v83_v59 = vand.u32 4294901760, %v82_v42  ;;  %v160_v61 = vand.u32 4294901760, %v159_v47  ;;  %v1585_v25 = vand.u32 4294901760, %v443_v19  ;;  %v1289_v47 = vmov 8.0  }
  0x1a   :  { %125 = vmatpush.msra.mxu1 %v124_v62  ;;  %68 = vmatpush.msra.mxu0 %v1389_v44  ;;  %v171_v62 = vsub.f32 %v1445_v21, %v170_v49  ;;  %v182_v2 = vand.u32 4294901760, %v1480_v50  ;;  %v177_v7 = vsub.f32 %v1469_v40, %v176_v56  ;;  %1248 = vrcp.f32 %v1289_v47 }
  0x1b   :  { %217 = vmatpush.msra.mxu2 %v1392_v45  ;;  %264 = vmatpush.msra.mxu3 %v1389_v44  ;;  %v1595_v33 = vsub.f32 %v443_v19, %v1585_v25 }
  0x1c   :  { %131 = vmatpush.msra.mxu1 %v130_v6  ;;  %70 = vmatpush.msra.mxu0 %v1394_v46  ;;  %v166_v6 = vand.u32 4294901760, %v165_v55  ;;  %v172_v29 = vand.u32 4294901760, %v171_v62  ;;  %v183_v30 = vsub.f32 %v1480_v50, %v182_v2 }
  0x1d   :  { %220 = vmatpush.msra.mxu2 %v1404_v51  ;;  %266 = vmatpush.msra.mxu3 %v1394_v46  ;;  %v511_v51 = vand.u32 4294901760, %v1595_v33 }
  0x1e   :  { %137 = vmatpush.msra.mxu1 %v136_v13  ;;  %72 = vmatpush.msra.mxu0 %v1406_v52  ;;  %v84_v13 = vsub.f32 %v82_v42, %v83_v59 }
  0x1f   :  { %223 = vmatpush.msra.mxu2 %v1418_v58  ;;  %268 = vmatpush.msra.mxu3 %v1406_v52 }
  0x20   :  { %143 = vmatpush.msra.mxu1 %v142_v37  ;;  %74 = vmatpush.msra.mxu0 %v1408_v54  ;;  %v178_v37 = vand.u32 4294901760, %v177_v7  ;;  %v85_v38 = vand.u32 4294901760, %v84_v13 }
  0x21   :  { %226 = vmatpush.msra.mxu2 %v1430_v0  ;;  %270 = vmatpush.msra.mxu3 %v1408_v54 }
  0x22   :  { %149 = vmatpush.msra.mxu1 %v148_v43  ;;  %76 = vmatpush.msra.mxu0 %v1423_v60  ;;  %v184_v43 = vand.u32 4294901760, %v183_v30  ;;  %v436_v30 = vld [vmem:[#allocation2 + $0xa8] sm:$0xff] }
  0x23   :  { %229 = vmatpush.msra.mxu2 %v1433_v1  ;;  %272 = vmatpush.msra.mxu3 %v1423_v60 }
  0x24   :  { %155 = vmatpush.msra.mxu1 %v154_v53  ;;  %78 = vmatpush.msra.mxu0 %v1442_v12 }
  0x25   :  { %232 = vmatpush.msra.mxu2 %v1445_v21  ;;  %274 = vmatpush.msra.mxu3 %v1442_v12 }
  0x26   :  { %161 = vmatpush.msra.mxu1 %v160_v61  ;;  %80 = vmatpush.msra.mxu0 %v1457_v34  ;;  %v437_v61 = vld [vmem:[#allocation2 + $0xb0] sm:$0xff] }
  0x27   :  { %235 = vmatpush.msra.mxu2 %v1469_v40  ;;  %276 = vmatpush.msra.mxu3 %v1457_v34  ;;  %v1656_v7 = vand.u32 4294901760, %v437_v61 }
  0x28   :  { %287 = vmatpush.msrb.mxu0 %v92_v22  ;;  %167 = vmatpush.msra.mxu1 %v166_v6 }
  0x29   :  { %238 = vmatpush.msra.mxu2 %v1480_v50  ;;  %280 = vmatmul.f32.vlgmr.msra.gmra.mxu3 %v83_v59 }
  0x2a   :  { %291 = vmatpush.msrb.mxu0 %v98_v23  ;;  %173 = vmatpush.msra.mxu1 %v172_v29 }
  0x2b   :  { %241 = vmatmul.f32.vlgmr.msra.gmra.mxu2 %v82_v42  ;;  %86 = vmatmul.f32.vlgmr.msra.gmra.mxu0 %v85_v38  ;;  %v438_v42 = vld [vmem:[#allocation2 + $0xb8] sm:$0xff] }
  0x2c   :  { %295 = vmatpush.msrb.mxu0 %v104_v24  ;;  %179 = vmatpush.msra.mxu1 %v178_v37  ;;  %v1641_v53 = vand.u32 4294901760, %v438_v42 }
  0x2e   :  { %299 = vmatpush.msrb.mxu0 %v110_v26  ;;  %185 = vmatpush.msra.mxu1 %v184_v43  ;;  %v442_v26 = vld [vmem:[#allocation2 + $0xd8] sm:$0xff]  ;;  %v1654_v6 = vsub.f32 %v438_v42, %v1641_v53 }
  0x2f   :  { %187 = vmatmul.f32.vlgmr.msra.gmra.mxu1 %v1459_v35 }
  0x30   :  { %354 = vmatpush.msrb.mxu1 %v1313_v3  ;;  %303 = vmatpush.msrb.mxu0 %v116_v27  ;;  %v446_v3 = vld [vmem:[#allocation2 + $0xf8] sm:$0xff]  ;;  %v541_v43 = vand.u32 4294901760, %v1654_v6 }
  0x32   :  { %356 = vmatpush.msrb.mxu1 %v1315_v4  ;;  %307 = vmatpush.msrb.mxu0 %v122_v39  ;;  %v1554_v4 = vand.u32 4294901760, %v446_v3 }
  0x34   :  { %358 = vmatpush.msrb.mxu1 %v1317_v5  ;;  %311 = vmatpush.msrb.mxu0 %v128_v41  ;;  %v445_v5 = vld [vmem:[#allocation2 + $0xf0] sm:$0xff]  ;;  %v1599_v41 = vand.u32 4294901760, %v442_v26 }
  0x35   :  { %451 = vmatpush.msrb.mxu2 %v1554_v4 }
  0x36   :  { %360 = vmatpush.msrb.mxu1 %v1319_v9  ;;  %315 = vmatpush.msrb.mxu0 %v134_v48  ;;  %v1559_v9 = vld [vmem:[%s2047_s2] sm:$0xff] }
  0x37   :  { %v48_v18 = vperm.slane %v1559_v9, 0 }
  0x38   :  { %362 = vmatpush.msrb.mxu1 %v1321_v10  ;;  %319 = vmatpush.msrb.mxu0 %v140_v57  ;;  %v1562_v10 = vsub.f32 %v446_v3, %v1554_v4  ;;  %v440_v57 = vld [vmem:[#allocation2 + $0xc8] sm:$0xff]  ;;  %v1665_v3 = vsub.f32 %v437_v61, %v1656_v7 }
  0x3a   :  { %364 = vmatpush.msrb.mxu1 %v1323_v11  ;;  %323 = vmatpush.msrb.mxu0 %v146_v63  ;;  %v1564_v11 = vand.u32 4294901760, %v445_v5  ;;  %v493_v15 = vand.u32 4294901760, %v1562_v10  ;;  %v1617_v63 = vand.u32 4294901760, %v440_v57 }
  0x3c   :  { %366 = vmatpush.msrb.mxu1 %v1335_v17  ;;  %327 = vmatpush.msrb.mxu0 %v152_v8  ;;  %v1570_v16 = vsub.f32 %v445_v5, %v1564_v11  ;;  %v1572_v17 = vand.u32 4294901760, %v444_v14  ;;  %v494_v22 = vsub.f32 %v1562_v10, %v493_v15  ;;  %v1669_v5 = vand.u32 4294901760, %v436_v30 }
  0x3d   :  { %453 = vmatpush.msrb.mxu2 %v1564_v11 }
  0x3e   :  { %368 = vmatpush.msrb.mxu1 %v1344_v20  ;;  %331 = vmatpush.msrb.mxu0 %v158_v31  ;;  %v499_v23 = vand.u32 4294901760, %v1570_v16  ;;  %v1583_v24 = vsub.f32 %v444_v14, %v1572_v17  ;;  %v495_v27 = vand.u32 4294901760, %v494_v22  ;;  %v435_v14 = vld [vmem:[#allocation2 + $0xa0] sm:$0xff]  ;;  %v542_v22 = vsub.f32 %v1654_v6, %v541_v43 }
  0x3f   :  { %455 = vmatpush.msrb.mxu2 %v1572_v17 }
  0x40   :  { %370 = vmatpush.msrb.mxu1 %v1370_v32  ;;  %335 = vmatpush.msrb.mxu0 %v164_v36  ;;  %v500_v28 = vsub.f32 %v1570_v16, %v499_v23  ;;  %v505_v32 = vand.u32 4294901760, %v1583_v24 }
  0x41   :  { %457 = vmatpush.msrb.mxu2 %v1585_v25  ;;  %496 = vmatpush.msrb.mxu3 %v495_v27 }
  0x42   :  { %372 = vmatpush.msrb.mxu1 %v1389_v44  ;;  %339 = vmatpush.msrb.mxu0 %v170_v49  ;;  %v441_v44 = vld [vmem:[#allocation2 + $0xd0] sm:$0xff]  ;;  %v506_v48 = vsub.f32 %v1583_v24, %v505_v32 }
  0x43   :  { %459 = vmatpush.msrb.mxu2 %v1599_v41 }
  0x44   :  { %374 = vmatpush.msrb.mxu1 %v1394_v46  ;;  %343 = vmatpush.msrb.mxu0 %v176_v56  ;;  %v501_v46 = vand.u32 4294901760, %v500_v28  ;;  %v507_v58 = vand.u32 4294901760, %v506_v48  ;;  %v1681_v28 = vsub.f32 %v436_v30, %v1669_v5 }
  0x46   :  { %376 = vmatpush.msrb.mxu1 %v1406_v52  ;;  %347 = vmatpush.msrb.mxu0 %v182_v2  ;;  %v1608_v52 = vsub.f32 %v442_v26, %v1599_v41  ;;  %v547_v26 = vand.u32 4294901760, %v1665_v3 }
  0x47   :  { %349 = vmatmul.f32.vlgmr.msrb.gmra.mxu0 %v1459_v35  ;;  %502 = vmatpush.msrb.mxu3 %v501_v46 }
  0x48   :  { %378 = vmatpush.msrb.mxu1 %v1408_v54  ;;  %594 = vmatpush.msra.mxu0 %v1562_v10  ;;  %v1610_v54 = vand.u32 4294901760, %v441_v44  ;;  %v517_v1 = vand.u32 4294901760, %v1608_v52  ;;  %v548_v46 = vsub.f32 %v1665_v3, %v547_v26 }
  0x49   :  { %508 = vmatpush.msrb.mxu3 %v507_v58  ;;  %v553_v58 = vand.u32 4294901760, %v1681_v28 }
  0x4a   :  { %380 = vmatpush.msrb.mxu1 %v1423_v60  ;;  %597 = vmatpush.msra.mxu0 %v1570_v16  ;;  %v512_v60 = vsub.f32 %v1595_v33, %v511_v51  ;;  %v1621_v8 = vsub.f32 %v441_v44, %v1610_v54  ;;  %v518_v36 = vsub.f32 %v1608_v52, %v517_v1  ;;  %v434_v44 = vld [vmem:[#allocation2 + $0x98] sm:$0xff] }
  0x4b   :  { %461 = vmatpush.msrb.mxu2 %v1610_v54  ;;  %v1689_v48 = vand.u32 4294901760, %v434_v44  ;;  %v554_v42 = vsub.f32 %v1681_v28, %v553_v58 }
  0x4c   :  { %382 = vmatpush.msrb.mxu1 %v1442_v12  ;;  %600 = vmatpush.msra.mxu0 %v1583_v24  ;;  %v439_v12 = vld [vmem:[#allocation2 + $0xc0] sm:$0xff]  ;;  %v513_v31 = vand.u32 4294901760, %v512_v60  ;;  %v523_v40 = vand.u32 4294901760, %v1621_v8  ;;  %v519_v56 = vand.u32 4294901760, %v518_v36 }
  0x4d   :  { %463 = vmatpush.msrb.mxu2 %v1617_v63 }
  0x4e   :  { %384 = vmatpush.msrb.mxu1 %v1457_v34  ;;  %603 = vmatpush.msra.mxu0 %v1595_v33  ;;  %v1626_v34 = vsub.f32 %v440_v57, %v1617_v63  ;;  %v524_v59 = vsub.f32 %v1621_v8, %v523_v40 }
  0x4f   :  { %386 = vmatmul.f32.vlgmr.msrb.gmra.mxu1 %v1459_v35  ;;  %v1628_v35 = vand.u32 4294901760, %v439_v12  ;;  %514 = vmatpush.msrb.mxu3 %v513_v31  ;;  %v1700_v31 = vsub.f32 %v434_v44, %v1689_v48 }
  0x50   :  { %647 = vmatpush.msra.mxu1 %v1554_v4  ;;  %606 = vmatpush.msra.mxu0 %v1608_v52  ;;  %v529_v49 = vand.u32 4294901760, %v1626_v34  ;;  %v525_v29 = vand.u32 4294901760, %v524_v59 }
  0x51   :  { %v1639_v50 = vsub.f32 %v439_v12, %v1628_v35  ;;  %465 = vmatpush.msrb.mxu2 %v1628_v35  ;;  %520 = vmatpush.msrb.mxu3 %v519_v56  ;;  %v565_v56 = vand.u32 4294901760, %v1700_v31 }
  0x52   :  { %649 = vmatpush.msra.mxu1 %v1564_v11  ;;  %609 = vmatpush.msra.mxu0 %v1621_v8  ;;  %v530_v62 = vsub.f32 %v1626_v34, %v529_v49 }
  0x53   :  { %v535_v2 = vand.u32 4294901760, %v1639_v50  ;;  %467 = vmatpush.msrb.mxu2 %v1641_v53  ;;  %526 = vmatpush.msrb.mxu3 %v525_v29  ;;  %v555_v29 = vand.u32 4294901760, %v554_v42 }
  0x54   :  { %651 = vmatpush.msra.mxu1 %v1572_v17  ;;  %612 = vmatpush.msra.mxu0 %v1626_v34  ;;  %v531_v37 = vand.u32 4294901760, %v530_v62 }
  0x55   :  { %v536_v38 = vsub.f32 %v1639_v50, %v535_v2  ;;  %469 = vmatpush.msrb.mxu2 %v1656_v7 }
  0x56   :  { %653 = vmatpush.msra.mxu1 %v1585_v25  ;;  %615 = vmatpush.msra.mxu0 %v1639_v50  ;;  %v427_v50 = vperm.slane %v1559_v9, 2 }
  0x57   :  { %532 = vmatpush.msrb.mxu3 %v531_v37  ;;  %471 = vmatpush.msrb.mxu2 %v1669_v5  ;;  %v431_v37 = vld [vmem:[#allocation2 + $0x80] sm:$0xff] }
  0x58   :  { %655 = vmatpush.msra.mxu1 %v1599_v41  ;;  %618 = vmatpush.msra.mxu0 %v1654_v6 }
  0x5a   :  { %657 = vmatpush.msra.mxu1 %v1610_v54  ;;  %621 = vmatpush.msra.mxu0 %v1665_v3 }
  0x5c   :  { %659 = vmatpush.msra.mxu1 %v1617_v63  ;;  %624 = vmatpush.msra.mxu0 %v1681_v28  ;;  %v840_v28 = vld [vmem:[#allocation2 + $0x178] sm:$0xff] }
  0x5e   :  { %661 = vmatpush.msra.mxu1 %v1628_v35 }
  0x60   :  { %663 = vmatpush.msra.mxu1 %v1641_v53 }
  0x62   :  { %665 = vmatpush.msra.mxu1 %v1656_v7 }
  0x64   :  { %667 = vmatpush.msra.mxu1 %v1669_v5 }
  0xa8   :  { %v87_v20 = vpop.f32.mrf.mxu0 }
  0xa9   :  { %v88_v39 = vadd.f32 %v87_v20, %v48_v18  ;;  %v1672_v18 = vpop.eup %1248  ;;  %v537_v20 = vand.u32 4294901760, %v536_v38 }
  0xaa   :  { %v397_v57 = vmul.f32 8.0, %v1672_v18  ;;  %vm401_vm0 = vweird.f32 %v1672_v18 }
  0xab   :  { %538 = vmatpush.msrb.mxu3 %v537_v20 }
  0xac   :  { %v188_v45 = vpop.f32.mrf.mxu1  ;;  %v281_v13 = vpop.f32.mrf.mxu3 }
  0xad   :  { %v189_v0 = vadd.f32 %v188_v45, %v88_v39  ;;  %v1683_v39 = vand.u32 4294901760, %v435_v14  ;;  %v543_v45 = vand.u32 4294901760, %v542_v22 }
  0xae   :  { %v242_v21 = vpop.f32.mrf.mxu2 }
  0xaf   :  { %v243_v55 = vadd.f32 %v242_v21, %v189_v0  ;;  %v1696_v60 = vsub.f32 %v435_v14, %v1683_v39  ;;  %v433_v0 = vld [vmem:[#allocation2 + $0x90] sm:$0xff]  ;;  %473 = vmatpush.msrb.mxu2 %v1683_v39  ;;  %v549_v21 = vand.u32 4294901760, %v548_v46  ;;  %669 = vmatpush.msra.mxu1 %v1683_v39  ;;  %v566_v14 = vsub.f32 %v1700_v31, %v565_v56 }
  0xb0   :  { %v1702_v36 = vand.u32 4294901760, %v433_v0  ;;  %544 = vmatpush.msrb.mxu3 %v543_v45 }
  0xb1   :  { %v282_v19 = vadd.f32 %v281_v13, %v243_v55  ;;  %v559_v47 = vand.u32 4294901760, %v1696_v60  ;;  %v432_v55 = vld [vmem:[#allocation2 + $0x88] sm:$0xff]  ;;  %475 = vmatpush.msrb.mxu2 %v1689_v48  ;;  %627 = vmatpush.msra.mxu0 %v1696_v60  ;;  %v398_v13 = vsub.f32 1.0, %v397_v57  ;;  %v567_v45 = vand.u32 4294901760, %v566_v14 }
  0xb2   :  { %v1713_v59 = vsub.f32 %v433_v0, %v1702_v36  ;;  %v1715_v61 = vand.u32 4294901760, %v432_v55  ;;  %671 = vmatpush.msra.mxu1 %v1689_v48  ;;  %550 = vmatpush.msrb.mxu3 %v549_v21 }
  0xb3   :  { %v560_v30 = vsub.f32 %v1696_v60, %v559_v47  ;;  %477 = vmatpush.msrb.mxu2 %v1702_v36  ;;  %630 = vmatpush.msra.mxu0 %v1700_v31  ;;  %v399_v0 = vmul.f32 %v1672_v18, %v398_v13  ;;  %v838_v60 = vld [vmem:[#allocation2 + $0x168] sm:$0xff] }
  0xb4   :  { %v1728_v20 = vsub.f32 %v432_v55, %v1715_v61  ;;  %673 = vmatpush.msra.mxu1 %v1702_v36  ;;  %556 = vmatpush.msrb.mxu3 %v555_v29 }
  0xb5   :  { %v561_v22 = vand.u32 4294901760, %v560_v30  ;;  %479 = vmatpush.msrb.mxu2 %v1715_v61  ;;  %633 = vmatpush.msra.mxu0 %v1713_v59  ;;  %v400_v30 = vadd.f32 %v1672_v18, %v399_v0  ;;  %v835_v0 = vld [vmem:[#allocation2 + $0x150] sm:$0xff] }
  0xb6   :  { %v577_v57 = vand.u32 4294901760, %v1728_v20  ;;  %675 = vmatpush.msra.mxu1 %v1715_v61 }
  0xb7   :  { %562 = vmatpush.msrb.mxu3 %v561_v22  ;;  %636 = vmatpush.msra.mxu0 %v1728_v20  ;;  %v1758_v16 = vsel %vm401_vm0, %v1672_v18, %v400_v30  ;;  %v836_v22 = vld [vmem:[#allocation2 + $0x158] sm:$0xff] }
  0xb8   :  { %v578_v55 = vsub.f32 %v1728_v20, %v577_v57 }
  0xb9   :  { %568 = vmatpush.msrb.mxu3 %v567_v45 }
  0xba   :  { %v579_v13 = vand.u32 4294901760, %v578_v55  ;;  %v1846_v55 = vand.u32 4294901760, %v835_v0 }
  0xc4   :  { %v350_v27 = vpop.f32.mrf.mxu0 }
  0xc5   :  { %v351_v12 = vadd.f32 %v350_v27, %v282_v19  ;;  %v571_v19 = vand.u32 4294901760, %v1713_v59  ;;  %v1732_v27 = vand.u32 4294901760, %v431_v37 }
  0xc7   :  { %v572_v46 = vsub.f32 %v1713_v59, %v571_v19  ;;  %481 = vmatpush.msrb.mxu2 %v1732_v27  ;;  %677 = vmatpush.msra.mxu1 %v1732_v27 }
  0xc9   :  { %v573_v42 = vand.u32 4294901760, %v572_v46  ;;  %688 = vmatpush.msra.mxu2 %v493_v15 }
  0xcb   :  { %692 = vmatpush.msra.mxu2 %v499_v23  ;;  %574 = vmatpush.msrb.mxu3 %v573_v42 }
  0xcc   :  { %v387_v62 = vpop.f32.mrf.mxu1 }
  0xcd   :  { %v388_v38 = vadd.f32 %v387_v62, %v351_v12  ;;  %v582_v12 = vsub.f32 %v431_v37, %v1732_v27  ;;  %696 = vmatpush.msra.mxu2 %v505_v32  ;;  %580 = vmatpush.msrb.mxu3 %v579_v13  ;;  %v1857_v13 = vld [vmem:[%s2047_s2 + $0x8] sm:$0xff] }
  0xcf   :  { %v390_v44 = vrot.slane %v388_v38, 4  ;;  %v583_v62 = vand.u32 4294901760, %v582_v12  ;;  %639 = vmatpush.msra.mxu0 %v582_v12  ;;  %700 = vmatpush.msra.mxu2 %v511_v51 }
  0xd1   :  { %v391_v21 = vadd.f32 %v390_v44, %v388_v38  ;;  %v584_v37 = vsub.f32 %v582_v12, %v583_v62  ;;  %704 = vmatpush.msra.mxu2 %v517_v1 }
  0xd3   :  { %v392_v29 = vrot.slane %v391_v21, 2  ;;  %v585_v10 = vand.u32 4294901760, %v584_v37  ;;  %708 = vmatpush.msra.mxu2 %v523_v40 }
  0xd5   :  { %v393_v14 = vadd.f32 %v392_v29, %v391_v21  ;;  %586 = vmatpush.msrb.mxu3 %v585_v10  ;;  %712 = vmatpush.msra.mxu2 %v529_v49  ;;  %v834_v29 = vld [vmem:[#allocation2 + $0x148] sm:$0xff] }
  0xd6   :  { %v1865_v10 = vand.u32 4294901760, %v834_v29 }
  0xd7   :  { %v394_v15 = vrot.slane %v393_v14, 1  ;;  %755 = vmatpush.msra.mxu3 %v1554_v4  ;;  %716 = vmatpush.msra.mxu2 %v535_v2 }
  0xd9   :  { %v395_v23 = vadd.f32 %v394_v15, %v393_v14  ;;  %757 = vmatpush.msra.mxu3 %v1564_v11  ;;  %720 = vmatpush.msra.mxu2 %v541_v43  ;;  %v1863_v14 = vsub.f32 %v835_v0, %v1846_v55 }
  0xdb   :  { %v403_v20 = vmul.f32 %v1758_v16, %v395_v23  ;;  %759 = vmatpush.msra.mxu3 %v1572_v17  ;;  %724 = vmatpush.msra.mxu2 %v547_v26  ;;  %v833_v23 = vld [vmem:[#allocation2 + $0x140] sm:$0xff] }
  0xdd   :  { %v404_v24 = vsub.f32 %v388_v38, %v403_v20  ;;  %761 = vmatpush.msra.mxu3 %v1585_v25  ;;  %728 = vmatpush.msra.mxu2 %v553_v58 }
  0xdf   :  { %v405_v32 = vmul.f32 %v404_v24, %v404_v24  ;;  %763 = vmatpush.msra.mxu3 %v1599_v41  ;;  %732 = vmatpush.msra.mxu2 %v559_v47  ;;  %v1813_v47 = vand.u32 4294901760, %v838_v60 }
  0xe1   :  { %v406_v4 = vrot.slane %v405_v32, 4  ;;  %765 = vmatpush.msra.mxu3 %v1610_v54  ;;  %736 = vmatpush.msra.mxu2 %v565_v56  ;;  %v837_v56 = vld [vmem:[#allocation2 + $0x160] sm:$0xff]  ;;  %v1823_v38 = vsub.f32 %v838_v60, %v1813_v47 }
  0xe3   :  { %v407_v11 = vadd.f32 %v406_v4, %v405_v32  ;;  %767 = vmatpush.msra.mxu3 %v1617_v63  ;;  %740 = vmatpush.msra.mxu2 %v571_v19  ;;  %v1825_v19 = vand.u32 4294901760, %v837_v56  ;;  %v899_v45 = vand.u32 4294901760, %v1823_v38  ;;  %v1872_v32 = vsub.f32 %v834_v29, %v1865_v10 }
  0xe4   :  { %v1874_v4 = vand.u32 4294901760, %v833_v23 }
  0xe5   :  { %v408_v17 = vrot.slane %v407_v11, 2  ;;  %769 = vmatpush.msra.mxu3 %v1628_v35  ;;  %744 = vmatpush.msra.mxu2 %v577_v57  ;;  %v1835_v46 = vsub.f32 %v837_v56, %v1825_v19  ;;  %v1839_v57 = vand.u32 4294901760, %v836_v22  ;;  %v900_v21 = vsub.f32 %v1823_v38, %v899_v45 }
  0xe7   :  { %v409_v25 = vadd.f32 %v408_v17, %v407_v11  ;;  %771 = vmatpush.msra.mxu3 %v1641_v53  ;;  %748 = vmatpush.msra.mxu2 %v583_v62  ;;  %v905_v42 = vand.u32 4294901760, %v1835_v46  ;;  %v1850_v62 = vsub.f32 %v836_v22, %v1839_v57  ;;  %v901_v30 = vand.u32 4294901760, %v900_v21 }
  0xe8   :  { %v449_v11 = vperm.slane %v1857_v13, 0 }
  0xe9   :  { %v410_v33 = vrot.slane %v409_v25, 1  ;;  %773 = vmatpush.msra.mxu3 %v1656_v7  ;;  %v906_v37 = vsub.f32 %v1835_v46, %v905_v42  ;;  %v911_v15 = vand.u32 4294901760, %v1850_v62 }
  0xeb   :  { %v411_v41 = vadd.f32 %v410_v33, %v409_v25  ;;  %775 = vmatpush.msra.mxu3 %v1669_v5  ;;  %v907_v20 = vand.u32 4294901760, %v906_v37  ;;  %v912_v17 = vsub.f32 %v1850_v62, %v911_v15  ;;  %v832_v25 = vld [vmem:[#allocation2 + $0x138] sm:$0xff] }
  0xed   :  { %v412_v51 = vmul.f32 %v411_v41, %v1758_v16  ;;  %777 = vmatpush.msra.mxu3 %v1683_v39  ;;  %v1800_v39 = vand.u32 4294901760, %v840_v28  ;;  %v923_v41 = vand.u32 4294901760, %v1872_v32 }
  0xef   :  { %v413_v52 = vadd.f32 1e-05, %v412_v51  ;;  %779 = vmatpush.msra.mxu3 %v1689_v48  ;;  %v839_v48 = vld [vmem:[#allocation2 + $0x170] sm:$0xff]  ;;  %845 = vmatpush.msrb.mxu0 %v1800_v39  ;;  %v1888_v51 = vsub.f32 %v833_v23, %v1874_v4 }
  0xf0   :  { %v1805_v58 = vand.u32 4294901760, %v839_v48  ;;  %v827_v23 = vld [vmem:[#allocation2 + $0x110] sm:$0xff] }
  0xf1   :  { %1250 = vrsqrt.f32 %v413_v52  ;;  %781 = vmatpush.msra.mxu3 %v1702_v36  ;;  %vm420_vm2 = vweird.f32 %v413_v52 }
  0xf2   :  { %v1811_v36 = vsub.f32 %v839_v48, %v1805_v58  ;;  %847 = vmatpush.msrb.mxu0 %v1805_v58 }
  0xf3   :  { %783 = vmatpush.msra.mxu3 %v1715_v61 }
  0xf4   :  { %v893_v61 = vand.u32 4294901760, %v1811_v36  ;;  %849 = vmatpush.msrb.mxu0 %v1813_v47 }
  0xf5   :  { %785 = vmatpush.msra.mxu3 %v1732_v27 }
  0xf6   :  { %v894_v44 = vsub.f32 %v1811_v36, %v893_v61  ;;  %851 = vmatpush.msrb.mxu0 %v1825_v19 }
  0xf7   :  { %v1251_v54 = vpop.eup %1250 }
  0xf8   :  { %v415_v63 = vmul.f32 %v1251_v54, %v413_v52  ;;  %vm421_vm1 = vweird.f32 %v1251_v54  ;;  %v895_v12 = vand.u32 4294901760, %v894_v44  ;;  %853 = vmatpush.msrb.mxu0 %v1839_v57  ;;  %v1890_v52 = vand.u32 4294901760, %v832_v25 }
  0xf9   :  { %vm422_vm3 = vmor %vm420_vm2, %vm421_vm1 }
  0xfa   :  { %v416_v1 = vmul.f32 %v1251_v54, %v415_v63  ;;  %855 = vmatpush.msrb.mxu0 %v1846_v55  ;;  %v831_v63 = vld [vmem:[#allocation2 + $0x130] sm:$0xff] }
  0xfc   :  { %v417_v8 = vmul.f32 0.5, %v416_v1  ;;  %857 = vmatpush.msrb.mxu0 %v1865_v10 }
  0xfe   :  { %v418_v34 = vsub.f32 1.5, %v417_v8  ;;  %859 = vmatpush.msrb.mxu0 %v1874_v4  ;;  %v924_v8 = vsub.f32 %v1872_v32, %v923_v41 }
 0x100   :  { %v419_v35 = vmul.f32 %v1251_v54, %v418_v34  ;;  %v929_v34 = vand.u32 4294901760, %v1888_v51  ;;  %861 = vmatpush.msrb.mxu0 %v1890_v52 }
 0x102   :  { %v423_v40 = vsel %vm422_vm3, %v1251_v54, %v419_v35  ;;  %v913_v54 = vand.u32 4294901760, %v912_v17  ;;  %v1900_v35 = vsub.f32 %v832_v25, %v1890_v52  ;;  %v1946_v25 = vand.u32 4294901760, %v827_v23 }
 0x103   :  { %v424_v49 = vmul.f32 %v423_v40, %v1559_v9  ;;  %v1803_v9 = vsub.f32 %v840_v28, %v1800_v39 }
 0x105   :  { %v425_v53 = vperm.slane %v424_v49, 1  ;;  %v887_v31 = vand.u32 4294901760, %v1803_v9 }
 0x107   :  { %v426_v2 = vmul.f32 %v425_v53, %v404_v24  ;;  %v888_v59 = vsub.f32 %v1803_v9, %v887_v31  ;;  %v917_v24 = vand.u32 4294901760, %v1863_v14  ;;  %v830_v53 = vld [vmem:[#allocation2 + $0x128] sm:$0xff] }
 0x109   :  { %v428_v6 = vadd.f32 %v427_v50, %v426_v2  ;;  %v889_v27 = vand.u32 4294901760, %v888_v59  ;;  %v918_v33 = vsub.f32 %v1863_v14, %v917_v24  ;;  %v1903_v50 = vand.u32 4294901760, %v831_v63 }
 0x10b   :  { %v429_v7 = vmax.f32 %v428_v6, 0.0  ;;  %890 = vmatpush.msrb.mxu1 %v889_v27  ;;  %v919_v1 = vand.u32 4294901760, %v918_v33  ;;  %v925_v6 = vand.u32 4294901760, %v924_v8  ;;  %863 = vmatpush.msrb.mxu0 %v1903_v50  ;;  %v828_v27 = vld [vmem:[#allocation2 + $0x118] sm:$0xff] }
 0x10c   :  { %v1933_v21 = vand.u32 4294901760, %v828_v27 }
 0x10d   :  { %v482_v43 = vand.u32 4294901760, %v429_v7  ;;  %896 = vmatpush.msrb.mxu1 %v895_v12 }
 0x10e   :  { %v1944_v17 = vsub.f32 %v828_v27, %v1933_v21 }
 0x10f   :  { %588 = vmatmul.f32.vlgmr.msrb.gmra.mxu3 %v482_v43  ;;  %v483_v3 = vsub.f32 %v429_v7, %v482_v43  ;;  %902 = vmatpush.msrb.mxu1 %v901_v30  ;;  %v930_v7 = vsub.f32 %v1888_v51, %v929_v34 }
 0x110   :  { %1041 = vmatpush.msrb.mxu3 %v1800_v39 }
 0x111   :  { %642 = vmatmul.f32.vlgmr.msra.gmra.mxu0 %v483_v3  ;;  %v484_v5 = vand.u32 4294901760, %v483_v3  ;;  %908 = vmatpush.msrb.mxu1 %v907_v20  ;;  %v931_v28 = vand.u32 4294901760, %v930_v7 }
 0x112   :  { %1043 = vmatpush.msrb.mxu3 %v1805_v58 }
 0x113   :  { %681 = vmatmul.f32.vlgmr.msra.gmra.mxu1 %v484_v5  ;;  %v485_v18 = vsub.f32 %v483_v3, %v484_v5  ;;  %v1913_v3 = vsub.f32 %v831_v63, %v1903_v50  ;;  %v1915_v5 = vand.u32 4294901760, %v830_v53 }
 0x114   :  { %1045 = vmatpush.msrb.mxu3 %v1813_v47  ;;  %914 = vmatpush.msrb.mxu1 %v913_v54 }
 0x115   :  { %v486_v26 = vand.u32 4294901760, %v485_v18  ;;  %v829_v18 = vld [vmem:[#allocation2 + $0x120] sm:$0xff]  ;;  %v941_v59 = vand.u32 4294901760, %v1913_v3  ;;  %v1927_v22 = vsub.f32 %v830_v53, %v1915_v5  ;;  %865 = vmatpush.msrb.mxu0 %v1915_v5  ;;  %v1959_v53 = vsub.f32 %v827_v23, %v1946_v25 }
 0x116   :  { %1047 = vmatpush.msrb.mxu3 %v1825_v19  ;;  %920 = vmatpush.msrb.mxu1 %v919_v1  ;;  %v1921_v60 = vand.u32 4294901760, %v829_v18  ;;  %v826_v1 = vld [vmem:[#allocation2 + $0x108] sm:$0xff] }
 0x117   :  { %487 = vmatmul.f32.vlgmr.msrb.gmra.mxu2 %v486_v26  ;;  %787 = vmatmul.f32.vlgmr.msra.gmra.mxu3 %v482_v43  ;;  %v942_v30 = vsub.f32 %v1913_v3, %v941_v59  ;;  %v947_v37 = vand.u32 4294901760, %v1927_v22  ;;  %v1963_v7 = vand.u32 4294901760, %v826_v1 }
 0x118   :  { %988 = vmatpush.msrb.mxu2 %v1803_v9  ;;  %1049 = vmatpush.msrb.mxu3 %v1839_v57  ;;  %v1931_v12 = vsub.f32 %v829_v18, %v1921_v60  ;;  %v825_v18 = vld [vmem:[#allocation2 + $0x100] sm:$0xff] }
 0x119   :  { %926 = vmatpush.msrb.mxu1 %v925_v6  ;;  %867 = vmatpush.msrb.mxu0 %v1921_v60  ;;  %v943_v54 = vand.u32 4294901760, %v942_v30  ;;  %v948_v63 = vsub.f32 %v1927_v22, %v947_v37  ;;  %v1973_v27 = vsub.f32 %v826_v1, %v1963_v7 }
 0x11a   :  { %991 = vmatpush.msrb.mxu2 %v1811_v36  ;;  %1051 = vmatpush.msrb.mxu3 %v1846_v55 }
 0x11b   :  { %932 = vmatpush.msrb.mxu1 %v931_v28  ;;  %869 = vmatpush.msrb.mxu0 %v1933_v21  ;;  %v949_v6 = vand.u32 4294901760, %v948_v63  ;;  %v971_v23 = vand.u32 4294901760, %v1973_v27 }
 0x11c   :  { %994 = vmatpush.msrb.mxu2 %v1823_v38  ;;  %1053 = vmatpush.msrb.mxu3 %v1865_v10 }
 0x11d   :  { %871 = vmatpush.msrb.mxu0 %v1946_v25  ;;  %v972_v63 = vsub.f32 %v1973_v27, %v971_v23 }
 0x11e   :  { %997 = vmatpush.msrb.mxu2 %v1835_v46  ;;  %1055 = vmatpush.msrb.mxu3 %v1874_v4 }
 0x11f   :  { %750 = vmatmul.f32.vlgmr.msra.gmra.mxu2 %v482_v43  ;;  %v935_v43 = vand.u32 4294901760, %v1900_v35  ;;  %873 = vmatpush.msrb.mxu0 %v1963_v7 }
 0x120   :  { %1000 = vmatpush.msrb.mxu2 %v1850_v62  ;;  %1057 = vmatpush.msrb.mxu3 %v1890_v52 }
 0x121   :  { %v936_v48 = vsub.f32 %v1900_v35, %v935_v43 }
 0x122   :  { %1003 = vmatpush.msrb.mxu2 %v1863_v14  ;;  %1059 = vmatpush.msrb.mxu3 %v1903_v50 }
 0x123   :  { %v937_v0 = vand.u32 4294901760, %v936_v48 }
 0x124   :  { %1006 = vmatpush.msrb.mxu2 %v1872_v32  ;;  %1061 = vmatpush.msrb.mxu3 %v1915_v5 }
 0x125   :  { %938 = vmatpush.msrb.mxu1 %v937_v0 }
 0x126   :  { %1009 = vmatpush.msrb.mxu2 %v1888_v51  ;;  %1063 = vmatpush.msrb.mxu3 %v1921_v60 }
 0x127   :  { %944 = vmatpush.msrb.mxu1 %v943_v54 }
 0x128   :  { %1012 = vmatpush.msrb.mxu2 %v1900_v35  ;;  %1065 = vmatpush.msrb.mxu3 %v1933_v21 }
 0x129   :  { %950 = vmatpush.msrb.mxu1 %v949_v6 }
 0x12a   :  { %1015 = vmatpush.msrb.mxu2 %v1913_v3  ;;  %1067 = vmatpush.msrb.mxu3 %v1946_v25 }
 0x12c   :  { %1018 = vmatpush.msrb.mxu2 %v1927_v22  ;;  %1069 = vmatpush.msrb.mxu3 %v1963_v7 }
 0x12e   :  { %1021 = vmatpush.msrb.mxu2 %v1931_v12 }
 0x130   :  { %1024 = vmatpush.msrb.mxu2 %v1944_v17 }
 0x132   :  { %1027 = vmatpush.msrb.mxu2 %v1959_v53 }
 0x134   :  { %1030 = vmatpush.msrb.mxu2 %v1973_v27 }
 0x18e   :  { %v643_v56 = vpop.f32.mrf.mxu0 }
 0x190   :  { %v682_v29 = vpop.f32.mrf.mxu1 }
 0x192   :  { %v589_v40 = vpop.f32.mrf.mxu3 }
 0x19a   :  { %v488_v49 = vpop.f32.mrf.mxu2 }
 0x19b   :  { %v489_v2 = vadd.f32 %v488_v49, %v449_v11  ;;  %v953_v11 = vand.u32 4294901760, %v1931_v12  ;;  %v959_v49 = vand.u32 4294901760, %v1944_v17 }
 0x19d   :  { %v590_v26 = vadd.f32 %v589_v40, %v489_v2  ;;  %v954_v40 = vsub.f32 %v1931_v12, %v953_v11  ;;  %v788_v2 = vpop.f32.mrf.mxu3  ;;  %v960_v48 = vsub.f32 %v1944_v17, %v959_v49 }
 0x19f   :  { %v644_v44 = vadd.f32 %v643_v56, %v590_v26  ;;  %v955_v28 = vand.u32 4294901760, %v954_v40  ;;  %v965_v56 = vand.u32 4294901760, %v1959_v53  ;;  %v973_v40 = vand.u32 4294901760, %v972_v63 }
 0x1a1   :  { %v683_v20 = vadd.f32 %v682_v29, %v644_v44  ;;  %v1975_v44 = vand.u32 4294901760, %v825_v18  ;;  %v961_v29 = vand.u32 4294901760, %v960_v48  ;;  %v966_v30 = vsub.f32 %v1959_v53, %v965_v56  ;;  %956 = vmatpush.msrb.mxu1 %v955_v28 }
 0x1a2   :  { %v751_v33 = vpop.f32.mrf.mxu2 }
 0x1a3   :  { %v752_v8 = vadd.f32 %v751_v33, %v683_v20  ;;  %v976_v20 = vsub.f32 %v825_v18, %v1975_v44  ;;  %875 = vmatpush.msrb.mxu0 %v1975_v44  ;;  %v967_v54 = vand.u32 4294901760, %v966_v30  ;;  %962 = vmatpush.msrb.mxu1 %v961_v29 }
 0x1a4   :  { %1071 = vmatpush.msrb.mxu3 %v1975_v44 }
 0x1a5   :  { %v789_v26 = vadd.f32 %v788_v2, %v752_v8  ;;  %1082 = vmatpush.msra.mxu0 %v887_v31  ;;  %v977_v1 = vand.u32 4294901760, %v976_v20  ;;  %1033 = vmatpush.msrb.mxu2 %v976_v20 }
 0x1a6   :  { %968 = vmatpush.msrb.mxu1 %v967_v54 }
 0x1a7   :  { %v791_v0 = vrot.slane %v789_v26, 4  ;;  %1086 = vmatpush.msra.mxu0 %v893_v61  ;;  %v978_v2 = vsub.f32 %v976_v20, %v977_v1 }
 0x1a8   :  { %974 = vmatpush.msrb.mxu1 %v973_v40 }
 0x1a9   :  { %v792_v33 = vadd.f32 %v791_v0, %v789_v26  ;;  %1090 = vmatpush.msra.mxu0 %v899_v45  ;;  %v979_v9 = vand.u32 4294901760, %v978_v2 }
 0x1ab   :  { %v793_v8 = vrot.slane %v792_v33, 2  ;;  %1094 = vmatpush.msra.mxu0 %v905_v42  ;;  %980 = vmatpush.msrb.mxu1 %v979_v9 }
 0x1ad   :  { %v794_v6 = vadd.f32 %v793_v8, %v792_v33  ;;  %1149 = vmatpush.msra.mxu1 %v1800_v39  ;;  %1098 = vmatpush.msra.mxu0 %v911_v15 }
 0x1af   :  { %v795_v31 = vrot.slane %v794_v6, 1  ;;  %1151 = vmatpush.msra.mxu1 %v1805_v58  ;;  %1102 = vmatpush.msra.mxu0 %v917_v24 }
 0x1b1   :  { %v796_v18 = vadd.f32 %v795_v31, %v794_v6  ;;  %1153 = vmatpush.msra.mxu1 %v1813_v47  ;;  %1106 = vmatpush.msra.mxu0 %v923_v41  ;;  %v821_v41 = vperm.slane %v1857_v13, 2 }
 0x1b3   :  { %v797_v36 = vmul.f32 %v796_v18, %v1758_v16  ;;  %1155 = vmatpush.msra.mxu1 %v1825_v19  ;;  %1110 = vmatpush.msra.mxu0 %v929_v34 }
 0x1b5   :  { %v798_v61 = vsub.f32 %v789_v26, %v797_v36  ;;  %1157 = vmatpush.msra.mxu1 %v1839_v57  ;;  %1114 = vmatpush.msra.mxu0 %v935_v43 }
 0x1b7   :  { %v799_v38 = vmul.f32 %v798_v61, %v798_v61  ;;  %1159 = vmatpush.msra.mxu1 %v1846_v55  ;;  %1118 = vmatpush.msra.mxu0 %v941_v59  ;;  %v1243_v59 = vld [vmem:[%s2047_s2 + $0x10] sm:$0xff] }
 0x1b9   :  { %v800_v39 = vrot.slane %v799_v38, 4  ;;  %1161 = vmatpush.msra.mxu1 %v1865_v10  ;;  %1122 = vmatpush.msra.mxu0 %v947_v37 }
 0x1bb   :  { %v801_v58 = vadd.f32 %v800_v39, %v799_v38  ;;  %1163 = vmatpush.msra.mxu1 %v1874_v4  ;;  %1126 = vmatpush.msra.mxu0 %v953_v11 }
 0x1bd   :  { %v802_v47 = vrot.slane %v801_v58, 2  ;;  %1165 = vmatpush.msra.mxu1 %v1890_v52  ;;  %1130 = vmatpush.msra.mxu0 %v959_v49 }
 0x1bf   :  { %v803_v19 = vadd.f32 %v802_v47, %v801_v58  ;;  %1167 = vmatpush.msra.mxu1 %v1903_v50  ;;  %1134 = vmatpush.msra.mxu0 %v965_v56  ;;  %v1215_v47 = vperm.slane %v1243_v59, 2 }
 0x1c1   :  { %v804_v45 = vrot.slane %v803_v19, 1  ;;  %1169 = vmatpush.msra.mxu1 %v1915_v5  ;;  %1138 = vmatpush.msra.mxu0 %v971_v23 }
 0x1c3   :  { %v805_v46 = vadd.f32 %v804_v45, %v803_v19  ;;  %1171 = vmatpush.msra.mxu1 %v1921_v60  ;;  %1142 = vmatpush.msra.mxu0 %v977_v1 }
 0x1c5   :  { %v806_v57 = vmul.f32 %v805_v46, %v1758_v16  ;;  %1173 = vmatpush.msra.mxu1 %v1933_v21 }
 0x1c7   :  { %v807_v42 = vadd.f32 1e-05, %v806_v57  ;;  %1175 = vmatpush.msra.mxu1 %v1946_v25 }
 0x1c9   :  { %1252 = vrsqrt.f32 %v807_v42  ;;  %1177 = vmatpush.msra.mxu1 %v1963_v7  ;;  %vm814_vm5 = vweird.f32 %v807_v42 }
 0x1cb   :  { %1179 = vmatpush.msra.mxu1 %v1975_v44 }
 0x1cf   :  { %v1253_v55 = vpop.eup %1252 }
 0x1d0   :  { %v809_v62 = vmul.f32 %v1253_v55, %v807_v42  ;;  %vm815_vm4 = vweird.f32 %v1253_v55 }
 0x1d1   :  { %vm816_vm6 = vmor %vm814_vm5, %vm815_vm4 }
 0x1d2   :  { %v810_v14 = vmul.f32 %v1253_v55, %v809_v62 }
 0x1d4   :  { %v811_v10 = vmul.f32 0.5, %v810_v14 }
 0x1d6   :  { %v812_v15 = vsub.f32 1.5, %v811_v10 }
 0x1d8   :  { %v813_v24 = vmul.f32 %v1253_v55, %v812_v15 }
 0x1da   :  { %v817_v32 = vsel %vm816_vm6, %v1253_v55, %v813_v24 }
 0x1db   :  { %v818_v4 = vmul.f32 %v1857_v13, %v817_v32  ;;  %v843_v13 = vperm.slane %v1243_v59, 0 }
 0x1dd   :  { %v819_v51 = vperm.slane %v818_v4, 1 }
 0x1df   :  { %v820_v52 = vmul.f32 %v819_v51, %v798_v61 }
 0x1e1   :  { %v822_v34 = vadd.f32 %v821_v41, %v820_v52 }
 0x1e3   :  { %v823_v35 = vmax.f32 %v822_v34, 0.0 }
 0x1e5   :  { %v876_v50 = vand.u32 4294901760, %v823_v35 }
 0x1e7   :  { %982 = vmatmul.f32.vlgmr.msrb.gmra.mxu1 %v876_v50  ;;  %v877_v43 = vsub.f32 %v823_v35, %v876_v50 }
 0x1e9   :  { %1036 = vmatmul.f32.vlgmr.msrb.gmra.mxu2 %v877_v43  ;;  %v878_v3 = vand.u32 4294901760, %v877_v43 }
 0x1eb   :  { %1075 = vmatmul.f32.vlgmr.msrb.gmra.mxu3 %v878_v3  ;;  %v879_v5 = vsub.f32 %v877_v43, %v878_v3 }
 0x1ed   :  { %v880_v60 = vand.u32 4294901760, %v879_v5 }
 0x1ef   :  { %881 = vmatmul.f32.vlgmr.msrb.gmra.mxu0 %v880_v60  ;;  %1181 = vmatmul.f32.vlgmr.msra.gmra.mxu1 %v876_v50 }
 0x1f7   :  { %1144 = vmatmul.f32.vlgmr.msra.gmra.mxu0 %v876_v50 }
 0x264   :  { %v983_v22 = vpop.f32.mrf.mxu1 }
 0x26c   :  { %v882_v12 = vpop.f32.mrf.mxu0  ;;  %v1037_v11 = vpop.f32.mrf.mxu2 }
 0x26d   :  { %v883_v21 = vadd.f32 %v882_v12, %v843_v13  ;;  %v1182_v26 = vpop.f32.mrf.mxu1 }
 0x26e   :  { %v1076_v25 = vpop.f32.mrf.mxu3 }
 0x26f   :  { %v984_v37 = vadd.f32 %v983_v22, %v883_v21 }
 0x271   :  { %v1038_v17 = vadd.f32 %v1037_v11, %v984_v37 }
 0x273   :  { %v1077_v49 = vadd.f32 %v1076_v25, %v1038_v17 }
 0x274   :  { %v1145_v53 = vpop.f32.mrf.mxu0 }
 0x275   :  { %v1146_v7 = vadd.f32 %v1145_v53, %v1077_v49 }
 0x277   :  { %v1183_v28 = vadd.f32 %v1182_v26, %v1146_v7 }
 0x279   :  { %v1185_v48 = vrot.slane %v1183_v28, 4 }
 0x27b   :  { %v1186_v56 = vadd.f32 %v1185_v48, %v1183_v28 }
 0x27d   :  { %v1187_v27 = vrot.slane %v1186_v56, 2 }
 0x27f   :  { %v1188_v44 = vadd.f32 %v1187_v27, %v1186_v56 }
 0x281   :  { %v1189_v0 = vrot.slane %v1188_v44, 1 }
 0x283   :  { %v1190_v29 = vadd.f32 %v1189_v0, %v1188_v44 }
 0x285   :  { %v1191_v30 = vmul.f32 %v1190_v29, %v1758_v16 }
 0x287   :  { %v1192_v23 = vsub.f32 %v1183_v28, %v1191_v30 }
 0x289   :  { %v1193_v20 = vmul.f32 %v1192_v23, %v1192_v23 }
 0x28b   :  { %v1194_v33 = vrot.slane %v1193_v20, 4 }
 0x28d   :  { %v1195_v54 = vadd.f32 %v1194_v33, %v1193_v20 }
 0x28f   :  { %v1196_v63 = vrot.slane %v1195_v54, 2 }
 0x291   :  { %v1197_v1 = vadd.f32 %v1196_v63, %v1195_v54 }
 0x293   :  { %v1198_v8 = vrot.slane %v1197_v1, 1 }
 0x295   :  { %v1199_v40 = vadd.f32 %v1198_v8, %v1197_v1 }
 0x297   :  { %v1200_v2 = vmul.f32 %v1199_v40, %v1758_v16 }
 0x299   :  { %v1201_v6 = vadd.f32 1e-05, %v1200_v2 }
 0x29b   :  { %1254 = vrsqrt.f32 %v1201_v6  ;;  %vm1208_vm8 = vweird.f32 %v1201_v6 }
 0x2a1   :  { %v1255_v9 = vpop.eup %1254 }
 0x2a2   :  { %v1203_v31 = vmul.f32 %v1255_v9, %v1201_v6  ;;  %vm1209_vm7 = vweird.f32 %v1255_v9 }
 0x2a3   :  { %vm1210_vm9 = vmor %vm1208_vm8, %vm1209_vm7 }
 0x2a4   :  { %v1204_v18 = vmul.f32 %v1255_v9, %v1203_v31 }
 0x2a6   :  { %v1205_v36 = vmul.f32 0.5, %v1204_v18 }
 0x2a8   :  { %v1206_v61 = vsub.f32 1.5, %v1205_v36 }
 0x2aa   :  { %v1207_v38 = vmul.f32 %v1255_v9, %v1206_v61 }
 0x2ac   :  { %v1211_v39 = vsel %vm1210_vm9, %v1255_v9, %v1207_v38 }
 0x2ad   :  { %v1212_v58 = vmul.f32 %v1243_v59, %v1211_v39 }
 0x2af   :  { %v1213_v19 = vperm.slane %v1212_v58, 1 }
 0x2b1   :  { %v1214_v45 = vmul.f32 %v1213_v19, %v1192_v23 }
 0x2b3   :  { %v1216_v46 = vadd.f32 %v1215_v47, %v1214_v45 }
 0x2b5   :  { %v1217_v57 = vsub.f32 0.0, %v1216_v46 }
 0x2b7   :  { %v1218_v42 = vmul.f32 1.442695, %v1217_v57 }
 0x2b9   :  { %1256 = vpow2.f32 %v1218_v42 }
 0x2bf   :  { %v1257_v16 = vpop.eup %1256 }
 0x2c0   :  { %v1220_v55 = vadd.f32 1.0, %v1257_v16 }
 0x2c2   :  { %1258 = vrcp.f32 %v1220_v55  ;;  %v1232_v15 = vand.u32 2147483648, %v1220_v55  ;;  %v1230_v32 = vand.u32 2147483647, %v1220_v55  ;;  %vm1226_vm11 = vweird.f32 %v1220_v55 }
 0x2c4   :  { %v1233_v41 = vor.u32 1.1754944e-38, %v1232_v15  ;;  %vm1231_vm13 = vcmp.eq.f32.partialorder %v1230_v32, 8.507059e+37 }
 0x2c8   :  { %v1259_v62 = vpop.eup %1258 }
 0x2c9   :  { %v1222_v14 = vmul.f32 %v1259_v62, %v1220_v55  ;;  %vm1227_vm10 = vweird.f32 %v1259_v62 }
 0x2ca   :  { %vm1228_vm12 = vmor %vm1226_vm11, %vm1227_vm10 }
 0x2cb   :  { %v1223_v10 = vsub.f32 1.0, %v1222_v14 }
 0x2cd   :  { %v1224_v24 = vmul.f32 %v1259_v62, %v1223_v10 }
 0x2cf   :  { %v1225_v4 = vadd.f32 %v1259_v62, %v1224_v24 }
 0x2d1   :  { %v1229_v51 = vsel %vm1228_vm12, %v1259_v62, %v1225_v4 }
 0x2d2   :  { %v1234_v52 = vsel %vm1231_vm13, %v1233_v41, %v1229_v51 }
 0x2d3   :  { %1236 = vst [vmem:[%s2048_s3] sm:$0xff] %v1234_v52 }
 0x2d4   :  { %1241 = vsyncpa [#allocation3], 1 }

</bundles_post_ra>
